<compile_context>
chip_gen: v7x
topology: tpu7x:2x2x1
jax: 0.10.0
libtpu: 0.0.40
codegen_flags: <defaults>
</compile_context>

<pallas_src>
import math
import functools

import jax
import jax.numpy as jnp
from jax import lax
from jax.experimental import pallas as pl
from jax.experimental.pallas import tpu as pltpu


def _attention_kernel(hs_ref, ctx_ref,
                      wq_ref, bq_ref, wk_ref, bk_ref, wv_ref, bv_ref,
                      o_ref, *, num_heads, head_dim):
    """One grid step == Bt batch elements.

    hs_ref : (Bt, Sq, D)      hidden_states tile   (pipelined)
    ctx_ref: (Bt, Sk, Dc)     context tile         (pipelined)
    wq_ref : (D,  H)  bq_ref: (1, H)               (whole-array VMEM, single copy)
    wk_ref : (Dc, H)  bk_ref: (1, H)
    wv_ref : (Dc, H)  bv_ref: (1, H)
    o_ref  : (Bt, Sq, H)      output tile
    """
    bt, sq, d_in = hs_ref.shape
    _, sk, d_ctx = ctx_ref.shape
    in_dt = hs_ref.dtype
    scale = 1.0 / math.sqrt(head_dim)

    # Collapse the batch block into rows (leading-dim reshape, layout-preserving
    # because either bt == 1 or Sq/Sk are multiples of 8 — enforced by the wrapper)
    # so the projection matmuls see Bt*Sq / Bt*Sk rows on the MXU.
    hs2 = hs_ref[...].reshape(bt * sq, d_in)                       # (Bt*Sq, D)
    ctx2 = ctx_ref[...].reshape(bt * sk, d_ctx)                    # (Bt*Sk, Dc)

    # QKV projections: model-dtype operands, f32 accumulation.  The 1/sqrt(d)
    # scale is folded into Q once (in f32) instead of scaling every score tile.
    # TODO(synk): optionally cast f32 operands to bf16 for the MXU on v5e.
    q = (jnp.dot(hs2, wq_ref[...], preferred_element_type=jnp.float32)
         + bq_ref[...].astype(jnp.float32)) * scale                # (Bt*Sq, H) f32
    k = (jnp.dot(ctx2, wk_ref[...], preferred_element_type=jnp.float32)
         + bk_ref[...].astype(jnp.float32))                        # (Bt*Sk, H) f32
    v = (jnp.dot(ctx2, wv_ref[...], preferred_element_type=jnp.float32)
         + bv_ref[...].astype(jnp.float32))                        # (Bt*Sk, H) f32

    # Feed the MXU in the model dtype (bf16 stays bf16); softmax stats stay f32.
    q = q.astype(in_dt)
    k = k.astype(in_dt)
    v = v.astype(in_dt)

    # Static unroll over the batch block and heads; the wrapper caps
    # bt * num_heads at ~32 so the bundle stream / vreg live ranges stay bounded.
    # TODO(synk): for large Sk, stream K/V chunks with an online (flash-style)
    # softmax instead of holding the full (Sq, Sk) score tile live.
    for b in range(bt):
        qb = q[b * sq:(b + 1) * sq, :]                             # (Sq, H)
        kb = k[b * sk:(b + 1) * sk, :]                             # (Sk, H)
        vb = v[b * sk:(b + 1) * sk, :]                             # (Sk, H)
        head_outs = []
        for h in range(num_heads):
            lo = h * head_dim
            hi = lo + head_dim
            qh = qb[:, lo:hi]                                      # (Sq, d)
            kh = kb[:, lo:hi]                                      # (Sk, d)
            vh = vb[:, lo:hi]                                      # (Sk, d)

            # Q @ K^T without an explicit transpose (contract last axes).
            scores = lax.dot_general(
                qh, kh, (((1,), (1,)), ((), ())),
                preferred_element_type=jnp.float32)                # (Sq, Sk) f32

            scores = scores - jnp.max(scores, axis=-1, keepdims=True)
            p = jnp.exp(scores)                                    # un-normalized probs
            denom = jnp.sum(p, axis=-1, keepdims=True)             # (Sq, 1) f32
            # TODO(synk): dropout on the probs omitted (eval-mode / p=0 semantics).

            # Deferred normalization: PV matmul on un-normalized probs, then a
            # cheap (Sq, head_dim) scale with the EUP approximate reciprocal.
            out_h = jnp.dot(p.astype(in_dt), vh,
                            preferred_element_type=jnp.float32)    # (Sq, d) f32
            out_h = out_h * pl.reciprocal(denom, approx=True)
            head_outs.append(out_h)

        # One lane-dense (full H lanes) store + one dtype cast per batch row.
        row = jnp.concatenate(head_outs, axis=-1)                  # (Sq, H) f32
        o_ref[b, :, :] = row.astype(o_ref.dtype)


def _vmem_capacity_bytes():
    """Per-core VMEM capacity; falls back to 64 MiB (v7x) if the query fails."""
    try:
        info = pltpu.get_tpu_info()
        cap = getattr(info, "vmem_capacity_bytes", None)
        if cap:
            return int(cap)
    except Exception:
        pass
    return 64 << 20


def _vmem_bytes_for_block(bb, Sq, Sk, D, Dc, H, itemsize):
    """Rough per-step VMEM footprint for a batch block of size bb."""
    tiles = 2 * bb * (Sq * D + Sk * Dc + Sq * H) * itemsize     # double-buffered in/out
    weights = ((D + 2 * Dc) * H + 3 * H) * itemsize             # single-buffered weights
    interm = bb * (Sq + 2 * Sk) * H * 4                         # f32 q / k / v
    scores = 2 * Sq * Sk * 4                                    # score + prob tile
    return tiles + weights + interm + scores


def _pick_batch_block(B, Sq, Sk, D, Dc, H, num_heads, itemsize, vmem_budget):
    """Pick block_b: >=2 grid steps, bounded unroll, VMEM-budgeted, MXU-M aligned."""
    # The in-kernel (Bt, S, D) -> (Bt*S, D) reshape is only layout-preserving when
    # S is sublane-aligned; otherwise keep one batch row per step (pure squeeze).
    if Sq % 8 != 0 or Sk % 8 != 0:
        return 1
    cap = B
    if B >= 2:
        cap = min(cap, B // 2)                  # >= 2 grid steps (megacore + DMA overlap)
    cap = min(cap, max(1, 32 // num_heads))     # bound static (batch, head) unroll
    candidates = [d for d in range(1, cap + 1)
                  if B % d == 0
                  and _vmem_bytes_for_block(d, Sq, Sk, D, Dc, H, itemsize) <= vmem_budget]
    if not candidates:
        return 1
    # Prefer a projection M (= bb*Sq) aligned to 256 (v6e/v7x MXU) then 128 (v5e),
    # then the largest block.
    return max(candidates,
               key=lambda d: (((d * Sq) % 256 == 0), ((d * Sq) % 128 == 0), d))


def attention_forward(hidden_states, context, params, *, num_heads, block_b=None):
    """Multi-head cross attention matching PyTorch Attention.forward
    (attention_mask=None, eval-mode dropout)."""
    B, Sq, D = hidden_states.shape
    _, Sk, Dc = context.shape
    H = params["wq"].shape[1]                   # all_head_size
    assert H % num_heads == 0, "all_head_size must be divisible by num_heads"
    head_dim = H // num_heads

    itemsize = jnp.dtype(hidden_states.dtype).itemsize
    vmem_cap = _vmem_capacity_bytes()
    vmem_budget = int(vmem_cap * 0.75)

    if block_b is None:
        block_b = _pick_batch_block(B, Sq, Sk, D, Dc, H, num_heads,
                                    itemsize, vmem_budget)
    assert B % block_b == 0

    # Scoped VMEM limit: generous for the chosen block, but within device capacity.
    need = _vmem_bytes_for_block(block_b, Sq, Sk, D, Dc, H, itemsize)
    vmem_limit = int(max(32 << 20, min(int(vmem_cap * 0.9), 2 * need + (8 << 20))))

    kernel = functools.partial(_attention_kernel,
                               num_heads=num_heads, head_dim=head_dim)

    # Whole-array VMEM residency (no per-step windowing, no double buffer) for the
    # grid-invariant weights and biases.
    vmem_full = pl.BlockSpec(memory_space=pltpu.MemorySpace.VMEM)

    return pl.pallas_call(
        kernel,
        out_shape=jax.ShapeDtypeStruct((B, Sq, H), hidden_states.dtype),
        grid_spec=pltpu.PrefetchScalarGridSpec(
            num_scalar_prefetch=0,
            grid=(B // block_b,),
            in_specs=[
                pl.BlockSpec((block_b, Sq, D), lambda i: (i, 0, 0)),   # hidden_states
                pl.BlockSpec((block_b, Sk, Dc), lambda i: (i, 0, 0)),  # context
                vmem_full,   # Wq
                vmem_full,   # bq
                vmem_full,   # Wk
                vmem_full,   # bk
                vmem_full,   # Wv
                vmem_full,   # bv
            ],
            out_specs=pl.BlockSpec((block_b, Sq, H), lambda i: (i, 0, 0)),
        ),
        compiler_params=pltpu.CompilerParams(
            dimension_semantics=("parallel",),
            vmem_limit_bytes=vmem_limit),
    )(hidden_states, context,
      params["wq"], params["bq"],
      params["wk"], params["bk"],
      params["wv"], params["bv"])


def attention_reference(hidden_states, context, params, *, num_heads):
    """Pure-JAX reference reproducing the PyTorch forward exactly (mask=None, eval)."""
    B, Sq, D = hidden_states.shape
    H = params["wq"].shape[1]
    d = H // num_heads

    def split_heads(x):  # (B, S, H) -> (B, nh, S, d)
        B_, S_, _ = x.shape
        return x.reshape(B_, S_, num_heads, d).transpose(0, 2, 1, 3)

    q = split_heads(hidden_states @ params["wq"] + params["bq"][0])
    k = split_heads(context @ params["wk"] + params["bk"][0])
    v = split_heads(context @ params["wv"] + params["bv"][0])

    scores = jnp.einsum("bhqd,bhkd->bhqk", q, k) / math.sqrt(d)
    probs = jax.nn.softmax(scores, axis=-1)
    out = jnp.einsum("bhqk,bhkd->bhqd", probs, v)        # (B, nh, Sq, d)
    return out.transpose(0, 2, 1, 3).reshape(B, Sq, H)


if __name__ == "__main__":
    # Small, module-consistent shapes.
    B, Sq, Sk = 2, 8, 8
    hidden_size = 32
    num_attention_heads = 4
    ctx_dim = hidden_size                     # ctx_dim defaults to hidden_size
    all_head_size = hidden_size

    key = jax.random.PRNGKey(0)
    k_hs, k_ctx, k_wq, k_bq, k_wk, k_bk, k_wv, k_bv = jax.random.split(key, 8)

    hidden_states = jax.random.normal(k_hs, (B, Sq, hidden_size), jnp.float32)
    context = jax.random.normal(k_ctx, (B, Sk, ctx_dim), jnp.float32)

    # Deterministic synthetic parameters (stored as (in, out); y = x @ W + b).
    params = {
        "wq": jax.random.normal(k_wq, (hidden_size, all_head_size), jnp.float32) * 0.1,
        "bq": jax.random.normal(k_bq, (1, all_head_size), jnp.float32) * 0.1,
        "wk": jax.random.normal(k_wk, (ctx_dim, all_head_size), jnp.float32) * 0.1,
        "bk": jax.random.normal(k_bk, (1, all_head_size), jnp.float32) * 0.1,
        "wv": jax.random.normal(k_wv, (ctx_dim, all_head_size), jnp.float32) * 0.1,
        "bv": jax.random.normal(k_bv, (1, all_head_size), jnp.float32) * 0.1,
    }

    out = attention_forward(hidden_states, context, params,
                            num_heads=num_attention_heads)
    out = jax.block_until_ready(out)

    ref = attention_reference(hidden_states, context, params,
                              num_heads=num_attention_heads)
    assert out.shape == (B, Sq, all_head_size)
    # Tolerance accounts for the EUP approximate reciprocal used in the
    # deferred softmax normalization.
    assert jnp.allclose(out, ref, atol=1e-2, rtol=1e-2), "mismatch vs reference"

    print("KERNEL_OK")
</pallas_src>

<mosaic_0001>
module attributes {stable_mosaic.version = 11 : i64} {
  func.func @_attention_kernel(%arg0: i32, %arg1: memref<1x8x32xf32, #tpu.memory_space<vmem>>, %arg2: memref<1x8x32xf32, #tpu.memory_space<vmem>>, %arg3: memref<32x32xf32, #tpu.memory_space<vmem>>, %arg4: memref<1x32xf32, #tpu.memory_space<vmem>>, %arg5: memref<32x32xf32, #tpu.memory_space<vmem>>, %arg6: memref<1x32xf32, #tpu.memory_space<vmem>>, %arg7: memref<32x32xf32, #tpu.memory_space<vmem>>, %arg8: memref<1x32xf32, #tpu.memory_space<vmem>>, %arg9: memref<1x8x32xf32, #tpu.memory_space<vmem>>) attributes {dimension_semantics = [#tpu.dimension_semantics<parallel>], iteration_bounds = array<i64: 2>, scalar_prefetch = 0 : i64, scratch_operands = 0 : i64, tpu.core_type = #tpu.core_type<tc>, window_params = [{transform_indices = @transform_0, window_bounds = array<i64: 1, 8, 32>}, {transform_indices = @transform_1, window_bounds = array<i64: 1, 8, 32>}, {pipeline_mode = #tpu.pipeline_mode<synchronous>, transform_indices = @transform_2, window_bounds = array<i64: 32, 32>}, {pipeline_mode = #tpu.pipeline_mode<synchronous>, transform_indices = @transform_3, window_bounds = array<i64: 1, 32>}, {pipeline_mode = #tpu.pipeline_mode<synchronous>, transform_indices = @transform_4, window_bounds = array<i64: 32, 32>}, {pipeline_mode = #tpu.pipeline_mode<synchronous>, transform_indices = @transform_5, window_bounds = array<i64: 1, 32>}, {pipeline_mode = #tpu.pipeline_mode<synchronous>, transform_indices = @transform_6, window_bounds = array<i64: 32, 32>}, {pipeline_mode = #tpu.pipeline_mode<synchronous>, transform_indices = @transform_7, window_bounds = array<i64: 1, 32>}, {transform_indices = @transform_8, window_bounds = array<i64: 1, 8, 32>}]} {
    %c0 = arith.constant 0 : index
    %c0_0 = arith.constant 0 : index
    %c0_1 = arith.constant 0 : index
    %0 = vector.load %arg1[%c0, %c0_0, %c0_1] : memref<1x8x32xf32, #tpu.memory_space<vmem>>, vector<1x8x32xf32>
    %1 = vector.shape_cast %0 : vector<1x8x32xf32> to vector<8x32xf32>
    %c0_2 = arith.constant 0 : index
    %c0_3 = arith.constant 0 : index
    %c0_4 = arith.constant 0 : index
    %2 = vector.load %arg2[%c0_2, %c0_3, %c0_4] : memref<1x8x32xf32, #tpu.memory_space<vmem>>, vector<1x8x32xf32>
    %3 = vector.shape_cast %2 : vector<1x8x32xf32> to vector<8x32xf32>
    %c0_5 = arith.constant 0 : index
    %c0_6 = arith.constant 0 : index
    %4 = vector.load %arg3[%c0_5, %c0_6] : memref<32x32xf32, #tpu.memory_space<vmem>>, vector<32x32xf32>
    %cst = arith.constant dense<0.000000e+00> : vector<8x32xf32>
    %5 = tpu.matmul %1, %4, %cst {dimension_numbers = #tpu.dot_dimension_numbers<[1], [0], [0], [1], [0, 0, 1, 1], [], []>} : vector<8x32xf32>, vector<32x32xf32>, vector<8x32xf32> -> vector<8x32xf32>
    %c0_7 = arith.constant 0 : index
    %c0_8 = arith.constant 0 : index
    %6 = vector.load %arg4[%c0_7, %c0_8] : memref<1x32xf32, #tpu.memory_space<vmem>>, vector<1x32xf32>
    %7 = vector.broadcast %6 : vector<1x32xf32> to vector<8x32xf32>
    %8 = arith.addf %5, %7 : vector<8x32xf32>
    %cst_9 = arith.constant 0.353553385 : f32
    %9 = vector.broadcast %cst_9 : f32 to vector<8x32xf32>
    %10 = arith.mulf %8, %9 : vector<8x32xf32>
    %c0_10 = arith.constant 0 : index
    %c0_11 = arith.constant 0 : index
    %11 = vector.load %arg5[%c0_10, %c0_11] : memref<32x32xf32, #tpu.memory_space<vmem>>, vector<32x32xf32>
    %cst_12 = arith.constant dense<0.000000e+00> : vector<8x32xf32>
    %12 = tpu.matmul %3, %11, %cst_12 {dimension_numbers = #tpu.dot_dimension_numbers<[1], [0], [0], [1], [0, 0, 1, 1], [], []>} : vector<8x32xf32>, vector<32x32xf32>, vector<8x32xf32> -> vector<8x32xf32>
    %c0_13 = arith.constant 0 : index
    %c0_14 = arith.constant 0 : index
    %13 = vector.load %arg6[%c0_13, %c0_14] : memref<1x32xf32, #tpu.memory_space<vmem>>, vector<1x32xf32>
    %14 = vector.broadcast %13 : vector<1x32xf32> to vector<8x32xf32>
    %15 = arith.addf %12, %14 : vector<8x32xf32>
    %c0_15 = arith.constant 0 : index
    %c0_16 = arith.constant 0 : index
    %16 = vector.load %arg7[%c0_15, %c0_16] : memref<32x32xf32, #tpu.memory_space<vmem>>, vector<32x32xf32>
    %cst_17 = arith.constant dense<0.000000e+00> : vector<8x32xf32>
    %17 = tpu.matmul %3, %16, %cst_17 {dimension_numbers = #tpu.dot_dimension_numbers<[1], [0], [0], [1], [0, 0, 1, 1], [], []>} : vector<8x32xf32>, vector<32x32xf32>, vector<8x32xf32> -> vector<8x32xf32>
    %c0_18 = arith.constant 0 : index
    %c0_19 = arith.constant 0 : index
    %18 = vector.load %arg8[%c0_18, %c0_19] : memref<1x32xf32, #tpu.memory_space<vmem>>, vector<1x32xf32>
    %19 = vector.broadcast %18 : vector<1x32xf32> to vector<8x32xf32>
    %20 = arith.addf %17, %19 : vector<8x32xf32>
    %21 = vector.extract_strided_slice %10 {offsets = [0, 0], sizes = [8, 8], strides = [1, 1]} : vector<8x32xf32> to vector<8x8xf32>
    %22 = vector.extract_strided_slice %15 {offsets = [0, 0], sizes = [8, 8], strides = [1, 1]} : vector<8x32xf32> to vector<8x8xf32>
    %23 = vector.extract_strided_slice %20 {offsets = [0, 0], sizes = [8, 8], strides = [1, 1]} : vector<8x32xf32> to vector<8x8xf32>
    %cst_20 = arith.constant dense<0.000000e+00> : vector<8x8xf32>
    %24 = tpu.matmul %21, %22, %cst_20 {dimension_numbers = #tpu.dot_dimension_numbers<[1], [1], [0], [0], [0, 0, 1, 0], [], []>} : vector<8x8xf32>, vector<8x8xf32>, vector<8x8xf32> -> vector<8x8xf32>
    %cst_21 = arith.constant dense<0xFF800000> : vector<8xf32>
    %25 = vector.multi_reduction <maximumf>, %24, %cst_21 [1] : vector<8x8xf32> to vector<8xf32>
    %26 = vector.shape_cast %25 : vector<8xf32> to vector<8x1xf32>
    %27 = vector.broadcast %26 : vector<8x1xf32> to vector<8x8xf32>
    %28 = arith.subf %24, %27 : vector<8x8xf32>
    %29 = math.exp %28 : vector<8x8xf32>
    %cst_22 = arith.constant dense<0.000000e+00> : vector<8xf32>
    %30 = vector.multi_reduction <add>, %29, %cst_22 [1] : vector<8x8xf32> to vector<8xf32>
    %31 = vector.shape_cast %30 : vector<8xf32> to vector<8x1xf32>
    %cst_23 = arith.constant dense<0.000000e+00> : vector<8x8xf32>
    %32 = tpu.matmul %29, %23, %cst_23 {dimension_numbers = #tpu.dot_dimension_numbers<[1], [0], [0], [1], [0, 0, 1, 1], [], []>} : vector<8x8xf32>, vector<8x8xf32>, vector<8x8xf32> -> vector<8x8xf32>
    %33 = tpu.reciprocal %31 {approx = true} : vector<8x1xf32> -> vector<8x1xf32>
    %34 = vector.broadcast %33 : vector<8x1xf32> to vector<8x8xf32>
    %35 = arith.mulf %32, %34 : vector<8x8xf32>
    %36 = vector.extract_strided_slice %10 {offsets = [0, 8], sizes = [8, 8], strides = [1, 1]} : vector<8x32xf32> to vector<8x8xf32>
    %37 = vector.extract_strided_slice %15 {offsets = [0, 8], sizes = [8, 8], strides = [1, 1]} : vector<8x32xf32> to vector<8x8xf32>
    %38 = vector.extract_strided_slice %20 {offsets = [0, 8], sizes = [8, 8], strides = [1, 1]} : vector<8x32xf32> to vector<8x8xf32>
    %cst_24 = arith.constant dense<0.000000e+00> : vector<8x8xf32>
    %39 = tpu.matmul %36, %37, %cst_24 {dimension_numbers = #tpu.dot_dimension_numbers<[1], [1], [0], [0], [0, 0, 1, 0], [], []>} : vector<8x8xf32>, vector<8x8xf32>, vector<8x8xf32> -> vector<8x8xf32>
    %cst_25 = arith.constant dense<0xFF800000> : vector<8xf32>
    %40 = vector.multi_reduction <maximumf>, %39, %cst_25 [1] : vector<8x8xf32> to vector<8xf32>
    %41 = vector.shape_cast %40 : vector<8xf32> to vector<8x1xf32>
    %42 = vector.broadcast %41 : vector<8x1xf32> to vector<8x8xf32>
    %43 = arith.subf %39, %42 : vector<8x8xf32>
    %44 = math.exp %43 : vector<8x8xf32>
    %cst_26 = arith.constant dense<0.000000e+00> : vector<8xf32>
    %45 = vector.multi_reduction <add>, %44, %cst_26 [1] : vector<8x8xf32> to vector<8xf32>
    %46 = vector.shape_cast %45 : vector<8xf32> to vector<8x1xf32>
    %cst_27 = arith.constant dense<0.000000e+00> : vector<8x8xf32>
    %47 = tpu.matmul %44, %38, %cst_27 {dimension_numbers = #tpu.dot_dimension_numbers<[1], [0], [0], [1], [0, 0, 1, 1], [], []>} : vector<8x8xf32>, vector<8x8xf32>, vector<8x8xf32> -> vector<8x8xf32>
    %48 = tpu.reciprocal %46 {approx = true} : vector<8x1xf32> -> vector<8x1xf32>
    %49 = vector.broadcast %48 : vector<8x1xf32> to vector<8x8xf32>
    %50 = arith.mulf %47, %49 : vector<8x8xf32>
    %51 = vector.extract_strided_slice %10 {offsets = [0, 16], sizes = [8, 8], strides = [1, 1]} : vector<8x32xf32> to vector<8x8xf32>
    %52 = vector.extract_strided_slice %15 {offsets = [0, 16], sizes = [8, 8], strides = [1, 1]} : vector<8x32xf32> to vector<8x8xf32>
    %53 = vector.extract_strided_slice %20 {offsets = [0, 16], sizes = [8, 8], strides = [1, 1]} : vector<8x32xf32> to vector<8x8xf32>
    %cst_28 = arith.constant dense<0.000000e+00> : vector<8x8xf32>
    %54 = tpu.matmul %51, %52, %cst_28 {dimension_numbers = #tpu.dot_dimension_numbers<[1], [1], [0], [0], [0, 0, 1, 0], [], []>} : vector<8x8xf32>, vector<8x8xf32>, vector<8x8xf32> -> vector<8x8xf32>
    %cst_29 = arith.constant dense<0xFF800000> : vector<8xf32>
    %55 = vector.multi_reduction <maximumf>, %54, %cst_29 [1] : vector<8x8xf32> to vector<8xf32>
    %56 = vector.shape_cast %55 : vector<8xf32> to vector<8x1xf32>
    %57 = vector.broadcast %56 : vector<8x1xf32> to vector<8x8xf32>
    %58 = arith.subf %54, %57 : vector<8x8xf32>
    %59 = math.exp %58 : vector<8x8xf32>
    %cst_30 = arith.constant dense<0.000000e+00> : vector<8xf32>
    %60 = vector.multi_reduction <add>, %59, %cst_30 [1] : vector<8x8xf32> to vector<8xf32>
    %61 = vector.shape_cast %60 : vector<8xf32> to vector<8x1xf32>
    %cst_31 = arith.constant dense<0.000000e+00> : vector<8x8xf32>
    %62 = tpu.matmul %59, %53, %cst_31 {dimension_numbers = #tpu.dot_dimension_numbers<[1], [0], [0], [1], [0, 0, 1, 1], [], []>} : vector<8x8xf32>, vector<8x8xf32>, vector<8x8xf32> -> vector<8x8xf32>
    %63 = tpu.reciprocal %61 {approx = true} : vector<8x1xf32> -> vector<8x1xf32>
    %64 = vector.broadcast %63 : vector<8x1xf32> to vector<8x8xf32>
    %65 = arith.mulf %62, %64 : vector<8x8xf32>
    %66 = vector.extract_strided_slice %10 {offsets = [0, 24], sizes = [8, 8], strides = [1, 1]} : vector<8x32xf32> to vector<8x8xf32>
    %67 = vector.extract_strided_slice %15 {offsets = [0, 24], sizes = [8, 8], strides = [1, 1]} : vector<8x32xf32> to vector<8x8xf32>
    %68 = vector.extract_strided_slice %20 {offsets = [0, 24], sizes = [8, 8], strides = [1, 1]} : vector<8x32xf32> to vector<8x8xf32>
    %cst_32 = arith.constant dense<0.000000e+00> : vector<8x8xf32>
    %69 = tpu.matmul %66, %67, %cst_32 {dimension_numbers = #tpu.dot_dimension_numbers<[1], [1], [0], [0], [0, 0, 1, 0], [], []>} : vector<8x8xf32>, vector<8x8xf32>, vector<8x8xf32> -> vector<8x8xf32>
    %cst_33 = arith.constant dense<0xFF800000> : vector<8xf32>
    %70 = vector.multi_reduction <maximumf>, %69, %cst_33 [1] : vector<8x8xf32> to vector<8xf32>
    %71 = vector.shape_cast %70 : vector<8xf32> to vector<8x1xf32>
    %72 = vector.broadcast %71 : vector<8x1xf32> to vector<8x8xf32>
    %73 = arith.subf %69, %72 : vector<8x8xf32>
    %74 = math.exp %73 : vector<8x8xf32>
    %cst_34 = arith.constant dense<0.000000e+00> : vector<8xf32>
    %75 = vector.multi_reduction <add>, %74, %cst_34 [1] : vector<8x8xf32> to vector<8xf32>
    %76 = vector.shape_cast %75 : vector<8xf32> to vector<8x1xf32>
    %cst_35 = arith.constant dense<0.000000e+00> : vector<8x8xf32>
    %77 = tpu.matmul %74, %68, %cst_35 {dimension_numbers = #tpu.dot_dimension_numbers<[1], [0], [0], [1], [0, 0, 1, 1], [], []>} : vector<8x8xf32>, vector<8x8xf32>, vector<8x8xf32> -> vector<8x8xf32>
    %78 = tpu.reciprocal %76 {approx = true} : vector<8x1xf32> -> vector<8x1xf32>
    %79 = vector.broadcast %78 : vector<8x1xf32> to vector<8x8xf32>
    %80 = arith.mulf %77, %79 : vector<8x8xf32>
    %81 = tpu.concatenate %35, %50, %65, %80 in 1 : vector<8x8xf32>, vector<8x8xf32>, vector<8x8xf32>, vector<8x8xf32> -> vector<8x32xf32>
    %c0_36 = arith.constant 0 : index
    %c0_37 = arith.constant 0 : index
    %c0_38 = arith.constant 0 : index
    %82 = vector.load %arg9[%c0_36, %c0_37, %c0_38] : memref<1x8x32xf32, #tpu.memory_space<vmem>>, vector<1x8x32xf32>
    %83 = vector.shape_cast %82 : vector<1x8x32xf32> to vector<8x32xf32>
    %84 = vector.shape_cast %81 : vector<8x32xf32> to vector<1x8x32xf32>
    tpu.vector_store %arg9[%c0_36, %c0_37, %c0_38], %84 {strides = array<i32>} : memref<1x8x32xf32, #tpu.memory_space<vmem>>, vector<1x8x32xf32>,
    return
  }
  func.func @transform_0(%arg0: i32) -> (i32, i32, i32) {
    %c0_i32 = arith.constant 0 : i32
    %c0_i32_0 = arith.constant 0 : i32
    %c0_i32_1 = arith.constant 0 : i32
    return %arg0, %c0_i32, %c0_i32_0 : i32, i32, i32
  }
  func.func @transform_1(%arg0: i32) -> (i32, i32, i32) {
    %c0_i32 = arith.constant 0 : i32
    %c0_i32_0 = arith.constant 0 : i32
    %c0_i32_1 = arith.constant 0 : i32
    return %arg0, %c0_i32, %c0_i32_0 : i32, i32, i32
  }
  func.func @transform_2(%arg0: i32) -> (i32, i32) {
    %c0_i32 = arith.constant 0 : i32
    %c0_i32_0 = arith.constant 0 : i32
    %c0_i32_1 = arith.constant 0 : i32
    return %c0_i32, %c0_i32_0 : i32, i32
  }
  func.func @transform_3(%arg0: i32) -> (i32, i32) {
    %c0_i32 = arith.constant 0 : i32
    %c0_i32_0 = arith.constant 0 : i32
    %c0_i32_1 = arith.constant 0 : i32
    return %c0_i32, %c0_i32_0 : i32, i32
  }
  func.func @transform_4(%arg0: i32) -> (i32, i32) {
    %c0_i32 = arith.constant 0 : i32
    %c0_i32_0 = arith.constant 0 : i32
    %c0_i32_1 = arith.constant 0 : i32
    return %c0_i32, %c0_i32_0 : i32, i32
  }
  func.func @transform_5(%arg0: i32) -> (i32, i32) {
    %c0_i32 = arith.constant 0 : i32
    %c0_i32_0 = arith.constant 0 : i32
    %c0_i32_1 = arith.constant 0 : i32
    return %c0_i32, %c0_i32_0 : i32, i32
  }
  func.func @transform_6(%arg0: i32) -> (i32, i32) {
    %c0_i32 = arith.constant 0 : i32
    %c0_i32_0 = arith.constant 0 : i32
    %c0_i32_1 = arith.constant 0 : i32
    return %c0_i32, %c0_i32_0 : i32, i32
  }
  func.func @transform_7(%arg0: i32) -> (i32, i32) {
    %c0_i32 = arith.constant 0 : i32
    %c0_i32_0 = arith.constant 0 : i32
    %c0_i32_1 = arith.constant 0 : i32
    return %c0_i32, %c0_i32_0 : i32, i32
  }
  func.func @transform_8(%arg0: i32) -> (i32, i32, i32) {
    %c0_i32 = arith.constant 0 : i32
    %c0_i32_0 = arith.constant 0 : i32
    %c0_i32_1 = arith.constant 0 : i32
    return %arg0, %c0_i32, %c0_i32_0 : i32, i32, i32
  }
}

</mosaic_0001>

<bundles_post_ra>
// kernel: tpu_custom_call.1
= control target key start
LH: loop header
LB: loop body
LE: loop exit
PB: predicated region body
PF: predicated region fallthrough
CT: control target
= control target key end

     0   :  { %s2396_s0 = inlined_call_operand.hbm [shape: f32[2,8,32], index: 0, kind: input, shape index: {}]   ;;  %s2397_s1 = inlined_call_operand.hbm [shape: f32[2,8,32], index: 1, kind: input, shape index: {}]   ;;  %s2398_s2 = inlined_call_operand.hbm [shape: f32[32,32], index: 2, kind: input, shape index: {}]   ;;  %s2399_s3 = inlined_call_operand.vmem [shape: f32[1,32], index: 3, kind: input, shape index: {}]   ;;  %s2400_s4 = inlined_call_operand.hbm [shape: f32[32,32], index: 4, kind: input, shape index: {}]   ;;  %s2401_s5 = inlined_call_operand.vmem [shape: f32[1,32], index: 5, kind: input, shape index: {}]   ;;  %s2402_s6 = inlined_call_operand.hbm [shape: f32[32,32], index: 6, kind: input, shape index: {}]   ;;  %s2403_s7 = inlined_call_operand.vmem [shape: f32[1,32], index: 7, kind: input, shape index: {}]   ;;  %s2404_s8 = inlined_call_operand.hbm [shape: f32[2,8,32], index: 8, kind: output, shape index: {}]  }
   0x1   :  { %2411 = sst [smem:[#allocation19_spill]] %s2398_s2 }
   0x2   :  { %2412 = sst [smem:[#allocation20_spill]] %s2400_s4 }
   0x3   :  { %2413 = sst [smem:[#allocation21_spill]] %s2402_s6 }
   0x4   :  { %13 = vsyncpa [#allocation3], 0 }
   0x5   :  { %15 = vsyncpa [#allocation3 + $0x1], 0 }
   0x6   :  { %16 = vsyncpa [#allocation6], 0 }
   0x7   :  { %18 = vsyncpa [#allocation6 + $0x1], 0 }
   0x8   :  { %19 = vsyncpa [#allocation9], 0 }
   0x9   :  { %20 = vsyncpa [#allocation4], 0 }
   0xa   :  { %22 = vsyncpa [#allocation4 + $0x1], 0  ;;  %s2020_s27 = smov 0   ;;  %s2022_s28 = smov 0  }
   0xb   :  { %s2024_s29 = smov 0   ;;  %s2026_s30 = smov 0  }
   0xc LB: > { %2414 = sst [smem:[#allocation17_spill]] %s1944_s27  ;;  %s2041_s9 = sadd.s32 4294967295, %s1956_s30   ;;  %s1956_s30 = sphi %s2026_s30, %s2441_s30   ;;  %s1952_s29 = sphi %s2024_s29, %s2440_s29   ;;  %s1948_s28 = sphi %s2022_s28, %s2439_s28   ;;  %s1944_s27 = sphi %s2020_s27, %s2438_s27  }
   0xd   : > { %s1464_s10 = sadd.s32 4294967294, %s1956_s30   ;;  %p48_p0 = scmp.ne.s32.totalorder %s1948_s28, %s1944_s27 }
   0xe   : > { %p2405_p1 = scmp.eq.s32.totalorder %s2041_s9, 0  ;;  %p230_p3 = scmp.eq.s32.totalorder %s1464_s10, 1 }
   0xf   : > { %p1465_p5 = scmp.ge.s32.totalorder %s1956_s30, 1  ;;  %p237_p7 = scmp.lt.s32.totalorder %s1956_s30, 3 }
  0x10   : > { %p2050_p4 = por %p2405_p1, %p48_p0  ;;  %p2055_p6 = por %p230_p3, %p48_p0 }
  0x11   : > { %p2060_p8 = pnand %p1465_p5, %p237_p7  ;;  %s1958_s14 = smov [#allocation7]  }
  0x12   : > { %s2415_s11 = scalar_select %p2050_p4, 1, 0 }
  0x13   : > { %s2416_s12 = scalar_select %p2055_p6, 1, 0 }
  0x14   : > { %s2418_s13 = scalar_select %p2060_p8, 1, 0 }
  0x15   : > { %2417 = sst [smem:[#allocation18_spill]] %s2416_s12  ;;  %s249_s15 = sshll.u32 %s1958_s14, 4  ;;  %s2064_s15 = int_to_ptr.vmem [resolvable:$true] %s249_s15 }
  0x16   : > { %p1643_p9 = pneg %p2060_p8  ;;  %s1959_s17 = smov [#allocation8]  }
  0x17   : > { %s265_s18 = sshll.u32 %s1959_s17, 4  ;;  %s1960_s19 = smov [#allocation10]   ;;  %s2075_s18 = int_to_ptr.vmem [resolvable:$true] %s265_s18 }
  0x18   : > { %p2071_p11 = pnand %p1643_p9, %p2405_p1  ;;  %s2077_s20 = sshll.u32 %s1960_s19, 4  ;;  %s282_s20 = int_to_ptr.vmem [resolvable:$true] %s2077_s20 }
  0x19   : > { %s2420_s2 = sld [smem:[#allocation19_spill]] }
  0x1a   : > { %p2087_p13 = pneg %p2071_p11 }
  0x1f   : > { %s1734_s23 = scalar_lea.hbm %s2420_s2, 512 }
  0x20   : > { %p1735_p12 = scmp.ne.s32.totalorder %s2420_s2, %s1734_s23  ;;  %p1741_p5 = scmp.lt.u32.totalorder %s1734_s23, %s2420_s2 }
  0x22   : > { %p1737_p0 = pnand %p2087_p13, %p1735_p12 }
  0x24   : > { %p1738_p3 = pneg %p1737_p0 }
  0x26   : > { %p1743_p7 = pnand %p1741_p5, %p1738_p3 }
  0x28   : > { %1746 = shalt.err (!%p1743_p7)
}
  0x29   : > { %s1747_s17 = scalar_lea.vmem %s2064_s15, 512  ;;  %p1755_p2 = scmp.lt.s32.totalorder %s2064_s15, %s2064_s15 }
  0x2a   : > { %p1748_p9 = scmp.ne.s32.totalorder %s2064_s15, %s1747_s17  ;;  %p1756_p6 = scmp.lt.s32.totalorder %s1747_s17, %s1747_s17 }
  0x2c   : > { %p1750_p10 = pnand %p1748_p9, %p2087_p13  ;;  %p1757_p12 = por %p1756_p6, %p1755_p2 }
  0x2e   : > { %p1751_p1 = pneg %p1750_p10 }
  0x30   : > { %p1758_p0 = pnand %p1757_p12, %p1751_p1 }
  0x32   : > { %1761 = shalt.err (!%p1758_p0)
}
  0x33   : > { %s1961_s19 = smov 128   ;;  %s1962_s21 = smov 8  }
  0x34   : > { %1646 = dma.hbm_to_vmem [thread:$0]  (!%p2071_p11), %s2420_s2, 512, %s2064_s15, [#allocation6], %s1961_s19, %s1961_s19, %s1962_s21  }
  0x35   : > { %s2422_s4 = sld [smem:[#allocation20_spill]] }
  0x3b   : > { %s1762_s10 = scalar_lea.hbm %s2422_s4, 512 }
  0x3c   : > { %p1763_p1 = scmp.ne.s32.totalorder %s2422_s4, %s1762_s10  ;;  %p1769_p10 = scmp.lt.u32.totalorder %s1762_s10, %s2422_s4 }
  0x3e   : > { %p1765_p2 = pnand %p1763_p1, %p2087_p13 }
  0x40   : > { %p1766_p6 = pneg %p1765_p2 }
  0x42   : > { %p1771_p3 = pnand %p1769_p10, %p1766_p6 }
  0x44   : > { %1774 = shalt.err (!%p1771_p3)
}
  0x45   : > { %s1775_s15 = scalar_lea.vmem %s2075_s18, 512  ;;  %p1783_p12 = scmp.lt.s32.totalorder %s2075_s18, %s2075_s18 }
  0x46   : > { %p1776_p5 = scmp.ne.s32.totalorder %s2075_s18, %s1775_s15  ;;  %p1784_p0 = scmp.lt.s32.totalorder %s1775_s15, %s1775_s15 }
  0x48   : > { %p1778_p7 = pnand %p1776_p5, %p2087_p13  ;;  %p1785_p1 = por %p1784_p0, %p1783_p12 }
  0x4a   : > { %p1779_p9 = pneg %p1778_p7 }
  0x4c   : > { %p1786_p2 = pnand %p1785_p1, %p1779_p9 }
  0x4e   : > { %1789 = shalt.err (!%p1786_p2)
}
  0x4f   : > { %1649 = dma.hbm_to_vmem [thread:$0]  (!%p2071_p11), %s2422_s4, 512, %s2075_s18, [#allocation9], %s1961_s19, %s1961_s19, %s1962_s21  }
  0x50   : > { %s2423_s6 = sld [smem:[#allocation21_spill]] }
  0x56   : > { %s1790_s24 = scalar_lea.hbm %s2423_s6, 512 }
  0x57   : > { %p1791_p6 = scmp.ne.s32.totalorder %s2423_s6, %s1790_s24  ;;  %p1797_p5 = scmp.lt.u32.totalorder %s1790_s24, %s2423_s6 }
  0x59   : > { %p1793_p10 = pnand %p1791_p6, %p2087_p13 }
  0x5b   : > { %p1794_p3 = pneg %p1793_p10 }
  0x5d   : > { %p1799_p7 = pnand %p1797_p5, %p1794_p3 }
  0x5f   : > { %1802 = shalt.err (!%p1799_p7)
}
  0x60   : > { %s1803_s15 = scalar_lea.vmem %s282_s20, 512  ;;  %p1811_p1 = scmp.lt.s32.totalorder %s282_s20, %s282_s20 }
  0x61   : > { %p1804_p9 = scmp.ne.s32.totalorder %s282_s20, %s1803_s15  ;;  %p1812_p2 = scmp.lt.s32.totalorder %s1803_s15, %s1803_s15 }
  0x63   : > { %p1806_p12 = pnand %p1804_p9, %p2087_p13  ;;  %p1813_p4 = por %p1812_p2, %p1811_p1 }
  0x65   : > { %p1807_p0 = pneg %p1806_p12 }
  0x67   : > { %p1814_p8 = pnand %p1813_p4, %p1807_p0 }
  0x69   : > { %1817 = shalt.err (!%p1814_p8)
}
  0x6a   : > { %1652 = dma.hbm_to_vmem [thread:$0]  (!%p2071_p11), %s2423_s6, 512, %s282_s20, [#allocation9], %s1961_s19, %s1961_s19, %s1962_s21  }
  0x6b   : > { %s2160_s26 = sadd.s32 1, %s1956_s30   ;;  %s35_s12 = sadd.s32 1, %s1952_s29 }
  0x6c   : > { %s32_s16 = ssub.s32 %s1956_s30, %s2160_s26  ;;  %p42_p8 = scmp.ne.s32.totalorder %s1952_s29, %s1948_s28 }
  0x6d   : > { %p33_p4 = scmp.eq.s32.totalorder %s32_s16, 0  ;;  %p43_p13 = scmp.eq.s32.totalorder %s1956_s30, 0 }
  0x6e   : > { %p1667_p6 = scmp.lt.s32.totalorder %s1956_s30, 2  ;;  %p2424_p3 = scmp.eq.s32.totalorder %s2041_s9, 1 }
  0x6f   : > { %s2170_s22 = scalar_select %p33_p4, %s1952_s29, %s35_s12  }
  0x70   : > { %p44_p10 = por %p43_p13, %p42_p8  ;;  %p2174_p5 = por %p2424_p3, %p42_p8 }
  0x71   : > { %s298_s24 = sand.u32 1, %s1952_s29   ;;  %s1471_s25 = sshll.u32 %s1956_s30, 7 }
  0x72   : > { %s2425_s23 = scalar_select %p2174_p5, 1, 0 }
  0x73   : > { %s2180_s20 = sshll.u32 %s298_s24, 3  ;;  %s2185_s10 = scalar_lea.hbm %s2396_s0, %s1471_s25 }
  0x74   : > { %s302_s14 = scalar_lea.vmem [#allocation2], %s2180_s20  ;;  %p2188_p11 = pnand %p1667_p6, %p44_p10 }
  0x75   : > { %s309_s17 = sshll.u32 %s302_s14, 4  ;;  %s2197_s16 = scalar_lea.hbm %s2397_s1, %s1471_s25  ;;  %s2192_s17 = int_to_ptr.vmem [resolvable:$true] %s309_s17 }
  0x76   : > { %s299_s12 = scalar_lea.sflag [#allocation3], %s298_s24  ;;  %s1818_s19 = scalar_lea.hbm %s2185_s10, 128 }
  0x77   : > { %p1819_p7 = scmp.ne.s32.totalorder %s2185_s10, %s1818_s19  ;;  %p1820_p9 = pneg %p2188_p11 }
  0x78   : > { %s1823_s2 = scalar_lea.hbm %s2396_s0, 256  ;;  %p1824_p1 = scmp.lt.u32.totalorder %s2185_s10, %s2396_s0 }
  0x79   : > { %p1821_p12 = pnand %p1820_p9, %p1819_p7  ;;  %p1825_p2 = scmp.lt.u32.totalorder %s1823_s2, %s1818_s19 }
  0x7a   : > { %p1827_p8 = scmp.lt.u32.totalorder %s1818_s19, %s2185_s10 }
  0x7b   : > { %p1822_p0 = pneg %p1821_p12  ;;  %p1826_p4 = por %p1825_p2, %p1824_p1 }
  0x7d   : > { %p1828_p13 = por %p1827_p8, %p1826_p4 }
  0x7f   : > { %p1829_p6 = pnand %p1828_p13, %p1822_p0 }
  0x81   : > { %1832 = shalt.err (!%p1829_p6)
}
  0x82   : > { %s1833_s24 = scalar_lea.vmem %s2192_s17, 128  ;;  %s1963_s25 = smov [#allocation2]  }
  0x83   : > { %p1834_p10 = scmp.ne.s32.totalorder %s2192_s17, %s1833_s24  ;;  %s1838_s18 = sshll.u32 %s1963_s25, 4  ;;  %s1839_s18 = int_to_ptr.vmem [resolvable:$false] %s1838_s18 }
  0x84   : > { %s1840_s4 = scalar_lea.vmem %s1839_s18, 256  ;;  %p1841_p12 = scmp.lt.s32.totalorder %s2192_s17, %s1839_s18 }
  0x85   : > { %p1836_p3 = pnand %p1834_p10, %p1820_p9  ;;  %p1842_p1 = scmp.lt.s32.totalorder %s1840_s4, %s1833_s24 }
  0x87   : > { %p1837_p7 = pneg %p1836_p3  ;;  %p1843_p2 = por %p1842_p1, %p1841_p12 }
  0x89   : > { %p1844_p4 = pnand %p1843_p2, %p1837_p7 }
  0x8b   : > { %1847 = shalt.err (!%p1844_p4)
}
  0x8c   : > { %1656 = dma.hbm_to_vmem [thread:$0]  (!%p2188_p11), %s2185_s10, 128, %s2192_s17, %s299_s12  }
  0x8d   : > { %s316_s2 = sand.u32 1, %s1956_s30   ;;  %s320_s6 = scalar_lea.vmem [#allocation5], %s2180_s20 }
  0x8e   : > { %s327_s27 = sshll.u32 %s320_s6, 4  ;;  %s317_s19 = scalar_lea.sflag [#allocation6], %s316_s2  ;;  %s328_s27 = int_to_ptr.vmem [resolvable:$true] %s327_s27 }
  0x8f   : > { %s1848_s21 = scalar_lea.hbm %s2197_s16, 128  ;;  %s1853_s25 = scalar_lea.hbm %s2397_s1, 256 }
  0x90   : > { %p1849_p0 = scmp.ne.s32.totalorder %s2197_s16, %s1848_s21  ;;  %p1854_p6 = scmp.lt.u32.totalorder %s2197_s16, %s2397_s1 }
  0x91   : > { %p1855_p10 = scmp.lt.u32.totalorder %s1853_s25, %s1848_s21  ;;  %p1857_p7 = scmp.lt.u32.totalorder %s1848_s21, %s2197_s16 }
  0x92   : > { %p1851_p8 = pnand %p1849_p0, %p1820_p9 }
  0x93   : > { %p1856_p3 = por %p1855_p10, %p1854_p6 }
  0x94   : > { %p1852_p13 = pneg %p1851_p8 }
  0x95   : > { %p1858_p12 = por %p1857_p7, %p1856_p3 }
  0x97   : > { %p1859_p1 = pnand %p1858_p12, %p1852_p13 }
  0x99   : > { %1862 = shalt.err (!%p1859_p1)
}
  0x9a   : > { %s1863_s20 = scalar_lea.vmem %s328_s27, 128  ;;  %s1964_s10 = smov [#allocation5]  }
  0x9b   : > { %p1864_p2 = scmp.ne.s32.totalorder %s328_s27, %s1863_s20  ;;  %s1868_s17 = sshll.u32 %s1964_s10, 4  ;;  %s1869_s17 = int_to_ptr.vmem [resolvable:$false] %s1868_s17 }
  0x9c   : > { %s1870_s12 = scalar_lea.vmem %s1869_s17, 256  ;;  %p1871_p8 = scmp.lt.s32.totalorder %s328_s27, %s1869_s17 }
  0x9d   : > { %p1866_p4 = pnand %p1864_p2, %p1820_p9  ;;  %p1872_p5 = scmp.lt.s32.totalorder %s1870_s12, %s1863_s20 }
  0x9f   : > { %p1867_p0 = pneg %p1866_p4  ;;  %p1873_p6 = por %p1872_p5, %p1871_p8 }
  0xa1   : > { %p1874_p10 = pnand %p1873_p6, %p1867_p0 }
  0xa3   : > { %1877 = shalt.err (!%p1874_p10)
}
  0xa4   : > { %1659 = dma.hbm_to_vmem [thread:$0]  (!%p2188_p11), %s2197_s16, 128, %s328_s27, %s317_s19  }
  0xa5   : > { %p2427_p13 = scmp.ne.s32.totalorder %s2418_s13, 0 }
  0xa6   : > { %s2248_s2 = sand.u32 (!%p2427_p13), 1, %s1948_s28   ;;  %p2428_p5 = scmp.ne.s32.totalorder (!%p2427_p13), %s2415_s11, 0 }
  0xa7   : > { %336 = sbr.rel (%p2427_p13) target bundleno = 1251 (0x4e3), region = 52  ;;  %s2251_s6 = sshll.u32 (!%p2427_p13), %s2248_s2, 3 }
  0xa8   : > { %s339_s21 = scalar_lea.sflag (!%p2427_p13), [#allocation3], %s2248_s2  ;;  %s342_s14 = scalar_lea.vmem (!%p2427_p13), [#allocation2], %s2251_s6 }
  0xae   : > { %1923 = dma.done.wait (%p2428_p5), %s339_s21, 128  }
  0xaf   : > { %1925 = vsyncadd (%p2428_p5), %s339_s21, 4294967168  ;;  %s347_s13 = sand.u32 1, %s2041_s9   ;;  %s351_s16 = scalar_lea.vmem [#allocation5], %s2251_s6 }
  0xb0   : > { %s348_s15 = scalar_lea.sflag [#allocation6], %s347_s13 }
  0xb1   : > { %1927 = dma.done.wait (%p2428_p5), %s348_s15, 128  }
  0xb2   : > { %1929 = vsyncadd (%p2428_p5), %s348_s15, 4294967168  ;;  %p2429_p11 = scmp.eq.s32.totalorder %s2041_s9, 0 }
  0xb4   : > { %1931 = dma.done.wait (%p2429_p11), [#allocation6], 512   ;;  %p2430_p9 = pmov %p2429_p11 }
  0xb6   : > { %1933 = vsyncadd (%p2430_p9), [#allocation6], 4294966784  ;;  %p2431_p3 = pmov %p2430_p9 }
  0xb8   : > { %1935 = dma.done.wait (%p2431_p3), [#allocation9], 1024   ;;  %p2432_p7 = pmov %p2431_p3 }
  0xb9   : > { %v1965_v0 = vmov 0.0|0.0   ;;  %vm1966_vm0 = vmmov 0   ;;  %v1967_v1 = vmov 0.0   ;;  %v489_v2 = vld [vmem:[#allocation8] sm:$0xff]  ;;  %v490_v3 = vld [vmem:[#allocation8 + $0x8] sm:$0xff]  ;;  %v491_v7 = vld [vmem:[#allocation8 + $0x10] sm:$0xff] }
  0xba   : > { %1937 = vsyncadd (%p2432_p7), [#allocation9], 4294966272  ;;  %1613 = vmatprep.subr.bf16.mxu1 %v1965_v0  ;;  %1607 = vmatprep.subr.bf16.mxu0 %v1965_v0  ;;  %v403_v4 = vld [vmem:[#allocation7] sm:$0xff]  ;;  %v1614_v5 = vpack.c.bf16 %v490_v3, %v489_v2  ;;  %v404_v6 = vld [vmem:[#allocation7 + $0x8] sm:$0xff]  ;;  %vm414_vm1 = vcmask 261120   ;;  %vm654_vm2 = vcmask 64512  }
  0xbb   : > { %1553 = vmatprep.mubr.msk.f32.mxu1 %vm1966_vm0, %v1967_v1  ;;  %1542 = vmatprep.mubr.msk.f32.mxu0 %vm1966_vm0, %v1967_v1  ;;  %v492_v8 = vld [vmem:[#allocation8 + $0x18] sm:$0xff]  ;;  %v1608_v9 = vpack.c.bf16 %v404_v6, %v403_v4  ;;  %v405_v10 = vld [vmem:[#allocation7 + $0x10] sm:$0xff]  ;;  %v401_v15 = vld [vmem:[%s342_s14] sm:$0xff]  ;;  %s1968_s25 = smov 112   ;;  %s1969_s18 = smov 120   ;;  %vm1324_vm3 = vcmask 130048  }
  0xbc   : > { %v406_v11 = vld [vmem:[#allocation7 + $0x18] sm:$0xff]  ;;  %1615 = vmatpush3.bf16.msra.mxu1 %v1614_v5  ;;  %v1617_v12 = vpack.c.bf16 %v492_v8, %v491_v7  ;;  %v573_v16 = vld [vmem:[#allocation10] sm:$0xff]  ;;  %v574_v17 = vld [vmem:[#allocation10 + $0x8] sm:$0xff]  ;;  %s1970_s4 = smov 104   ;;  %s1971_s17 = smov 8   ;;  %vm1326_vm4 = vcmask 195584  }
  0xbd   : > { %1609 = vmatpush3.bf16.msra.mxu0 %v1608_v9  ;;  %1616 = vmatprep.subr.bf16.mxu1 %v1965_v0  ;;  %v1611_v13 = vpack.c.bf16 %v406_v11, %v405_v10  ;;  %v402_v14 = vld [vmem:[%s351_s16] sm:$0xff]  ;;  %v1620_v19 = vpack.c.bf16 %v574_v17, %v573_v16  ;;  %v1483_v22 = vld [vmem:[%s2401_s5] ss:$0 sm:$0xff]  ;;  %s1972_s12 = smov 16   ;;  %s1973_s21 = smov 24  }
  0xbe   : > { %1610 = vmatprep.subr.bf16.mxu0 %v1965_v0  ;;  %v575_v18 = vld [vmem:[#allocation10 + $0x10] sm:$0xff]  ;;  %v576_v20 = vld [vmem:[#allocation10 + $0x18] sm:$0xff]  ;;  %v1481_v23 = vld [vmem:[%s2399_s3] ss:$0 sm:$0xff]  ;;  %s1500_s14 = sshll.u32 %s2041_s9, 7  ;;  %s400_s13 = scalar_lea.vmem [#allocation11], %s2251_s6 }
  0xbf   : > { %v1623_v21 = vpack.c.bf16 %v576_v20, %v575_v18  ;;  %v1485_v31 = vld [vmem:[%s2403_s7] ss:$0 sm:$0xff]  ;;  %s1343_s15 = sshll.u32 %s400_s13, 4  ;;  %s2351_s27 = scalar_lea.hbm %s2404_s8, %s1500_s14  ;;  %s2353_s15 = int_to_ptr.vmem [resolvable:$true] %s1343_s15 }
  0xc0   : > { %1618 = vmatpush3.bf16.msra.mxu1 %v1617_v12  ;;  %s1330_s9 = scalar_lea.sflag [#allocation4], %s2248_s2  ;;  %s1878_s6 = scalar_lea.vmem %s2353_s15, 128 }
  0xc1   : > { %1612 = vmatpush3.bf16.msra.mxu0 %v1611_v13  ;;  %1567 = vmatprep.subr.mxu1 %v1967_v1  ;;  %p1879_p12 = scmp.ne.s32.totalorder %s2353_s15, %s1878_s6  ;;  %p2433_p1 = scmp.ne.s32.totalorder %s2425_s23, 0 }
  0xc2   : > { %1619 = vmatprep.subr.bf16.mxu0 %v1965_v0  ;;  %s1974_s19 = smov [#allocation11]  }
  0xc3   : > { %1554 = vmatmul.mubr.msk.f32.vlgmr.msra.gmra.mrb[0].mxu1 %vm414_vm1, %v402_v14  ;;  %p1880_p2 = pnand %p1879_p12, %p2433_p1  ;;  %s1882_s24 = sshll.u32 %s1974_s19, 4  ;;  %s1883_s24 = int_to_ptr.vmem [resolvable:$false] %s1882_s24 }
  0xc4   : > { %1543 = vmatmul.mubr.msk.f32.vlgmr.msra.gmra.mrb[0].mxu0 %vm414_vm1, %v401_v15  ;;  %1569 = vmatprep.mubr.msk.f32.mxu1 %vm1966_vm0, %v1967_v1  ;;  %p1885_p0 = scmp.lt.s32.totalorder %s2353_s15, %s1883_s24 }
  0xc5   : > { %1564 = vmatprep.mubr.msk.f32.mxu0 %vm1966_vm0, %v1967_v1  ;;  %1621 = vmatpush3.bf16.msra.mxu0 %v1620_v19  ;;  %p1881_p4 = pneg %p1880_p2 }
  0xc6   : > { %1622 = vmatprep.subr.bf16.mxu0 %v1965_v0 }
  0xc9   : > { %1624 = vmatpush3.bf16.msra.mxu0 %v1623_v21 }
  0xca   : > { %1577 = vmatprep.subr.mxu0 %v1967_v1 }
  0xcc   : > { %1565 = vmatmul.mubr.msk.f32.vlgmr.msra.gmra.mrb[2].mxu0 %vm414_vm1, %v402_v14 }
  0xcd   : > { %1579 = vmatprep.mubr.msk.f32.mxu0 %vm1966_vm0, %v1967_v1 }
 0x196   : > { %v569_v24 = vpop.f32.mrb[0].mxu1 }
 0x197   : > { %v570_v25 = vadd.f32 %v1483_v22, %v569_v24  ;;  %v484_v26 = vpop.f32.mrb[0].mxu0  ;;  %v1555_v27 = vpop.f32.mrb[1].mxu1 }
 0x198   : > { %v485_v28 = vadd.f32 %v1481_v23, %v484_v26  ;;  %v1544_v29 = vpop.f32.mrb[1].mxu0 }
 0x199   : > { %983 = vrot.lane.b32.xlu1 %v570_v25, %s1968_s25  ;;  %817 = vrot.lane.b32.xlu0 %v570_v25, %s1969_s18 }
 0x19a   : > { %v488_v30 = vmul.f32 0.35355338, %v485_v28  ;;  %1568 = vmatpush3.xpose.msk.msra.mxu1 %vm654_vm2, %v570_v25 }
 0x19b   : > { %1572 = vmatprep.subr.mxu1 %v1967_v1 }
 0x19d   : > { %1570 = vmatmul.mubr.msk.f32.vlgmr.msra.gmra.mrb[2].mxu1 %vm654_vm2, %v488_v30  ;;  %981 = vrot.lane.b32.xlu1 %v488_v30, %s1968_s25 }
 0x19e   : > { %815 = vrot.lane.b32.xlu0 %v488_v30, %s1969_s18  ;;  %1574 = vmatprep.mubr.msk.f32.mxu1 %vm1966_vm0, %v1967_v1 }
 0x19f   : > { %v650_v32 = vpop.f32.mrb[2].mxu0 }
 0x1a0   : > { %v651_v33 = vadd.f32 %v1485_v31, %v650_v32  ;;  %v1566_v34 = vpop.f32.mrb[3].mxu0 }
 0x1a1   : > { %1146 = vrot.lane.b32.xlu1 %v488_v30, %s1970_s4 }
 0x1a2   : > { %1148 = vrot.lane.b32.xlu0 %v570_v25, %s1970_s4  ;;  %1573 = vmatpush3.msra.mxu1 %v651_v33 }
 0x1a3   : > { %1582 = vmatprep.subr.mxu1 %v1967_v1 }
 0x1a5   : > { %903 = vrot.lane.b32.xlu1 %v651_v33, %s1969_s18 }
 0x20b   : > { %v818_v35 = vpop.permute.xlu0 %817  ;;  %v984_v36 = vpop.permute.xlu1 %983 }
 0x20c   : > { %1578 = vmatpush3.xpose.msk.msra.mxu0 %vm654_vm2, %v818_v35 }
 0x20d   : > { %1587 = vmatprep.subr.mxu0 %v1967_v1 }
 0x20f   : > { %v982_v38 = vpop.permute.xlu1 %981 }
 0x210   : > { %v816_v37 = vpop.permute.xlu0 %815 }
 0x211   : > { %1580 = vmatmul.mubr.msk.f32.vlgmr.msra.gmra.mrb[4].mxu0 %vm654_vm2, %v816_v37 }
 0x212   : > { %1588 = vmatpush3.xpose.msk.msra.mxu0 %vm654_vm2, %v984_v36  ;;  %1589 = vmatprep.mubr.msk.f32.mxu0 %vm1966_vm0, %v1967_v1 }
 0x213   : > { %1597 = vmatprep.subr.mxu0 %v1967_v1  ;;  %v1147_v40 = vpop.permute.xlu1 %1146 }
 0x214   : > { %v1149_v39 = vpop.permute.xlu0 %1148 }
 0x215   : > { %1590 = vmatmul.mubr.msk.f32.vlgmr.msra.gmra.mrb[6].mxu0 %vm654_vm2, %v982_v38 }
 0x216   : > { %1598 = vmatpush3.xpose.msk.msra.mxu0 %vm654_vm2, %v1149_v39  ;;  %1599 = vmatprep.mubr.msk.f32.mxu0 %vm1966_vm0, %v1967_v1 }
 0x217   : > { %v904_v56 = vpop.permute.xlu1 %903 }
 0x219   : > { %1600 = vmatmul.mubr.msk.f32.vlgmr.msra.gmra.mrb[8].mxu0 %vm654_vm2, %v1147_v40 }
 0x270   : > { %v727_v41 = vpop.f32.mrb[2].mxu1 }
 0x271   : > { %v1571_v42 = vpop.f32.mrb[3].mxu1  ;;  %v731_v43 = vsel %vm654_vm2, %v727_v41, -inf }
 0x272   : > { %732 = vmax.xlane.f32.xlu0 %v731_v43 }
 0x2e4   : > { %v889_v44 = vpop.f32.mrb[4].mxu0 }
 0x2e5   : > { %v1581_v45 = vpop.f32.mrb[5].mxu0  ;;  %v893_v46 = vsel %vm654_vm2, %v889_v44, -inf }
 0x2e6   : > { %894 = vmax.xlane.f32.xlu1 %v893_v46 }
 0x2e8   : > { %v1055_v47 = vpop.f32.mrb[6].mxu0 }
 0x2e9   : > { %v1591_v48 = vpop.f32.mrb[7].mxu0  ;;  %v1059_v49 = vsel %vm654_vm2, %v1055_v47, -inf }
 0x2ea   : > { %1060 = vmax.xlane.f32.xlu0 %v1059_v49 }
 0x2ec   : > { %v1220_v50 = vpop.f32.mrb[8].mxu0 }
 0x2ed   : > { %v1601_v51 = vpop.f32.mrb[9].mxu0  ;;  %v1224_v52 = vsel %vm654_vm2, %v1220_v50, -inf }
 0x2ee   : > { %1225 = vmax.xlane.f32.xlu0 %v1224_v52 }
 0x2f7   : > { %1233 = vrot.lane.b32.xlu1 %v651_v33, %s1970_s4 }
 0x2ff   : > { %v733_v53 = vpop.xlane.xlu0 %732 }
 0x300   : > { %v734_v54 = vsub.f32 %v727_v41, %v733_v53 }
 0x302   : > { %v735_v55 = vmul.f32 1.442695, %v734_v54 }
 0x304   : > { %1718 = vpow2.f32 %v735_v55  ;;  %1068 = vrot.lane.b32.xlu0 %v651_v33, %s1968_s25  ;;  %s1884_s25 = scalar_lea.vmem %s1883_s24, 256 }
 0x305   : > { %p1886_p8 = scmp.lt.s32.totalorder %s1884_s25, %s1878_s6 }
 0x307   : > { %p1887_p6 = por %p1886_p8, %p1885_p0 }
 0x309   : > { %p1888_p10 = pnand %p1887_p6, %p1881_p4 }
 0x30e   : > { %v1719_v57 = vpop.eup %1718 }
 0x30f   : > { %1575 = vmatmul.mubr.msk.f32.vlgmr.msra.gmra.mrb[4].mxu1 %vm654_vm2, %v1719_v57  ;;  %v737_v9 = vsel %vm654_vm2, %v1719_v57, 0.0 }
 0x310   : > { %1583 = vmatpush3.msra.mxu1 %v904_v56  ;;  %1584 = vmatprep.mubr.msk.f32.mxu1 %vm1966_vm0, %v1967_v1 }
 0x311   : > { %1592 = vmatprep.subr.mxu1 %v1967_v1 }
 0x373   : > { %v895_v58 = vpop.xlane.xlu1 %894 }
 0x374   : > { %v896_v59 = vsub.f32 %v889_v44, %v895_v58 }
 0x376   : > { %v897_v60 = vmul.f32 1.442695, %v896_v59 }
 0x377   : > { %v1061_v61 = vpop.xlane.xlu0 %1060  ;;  %v1234_v8 = vpop.permute.xlu1 %1233 }
 0x378   : > { %1720 = vpow2.f32 %v897_v60  ;;  %v1062_v62 = vsub.f32 %v1055_v47, %v1061_v61 }
 0x37a   : > { %v1063_v63 = vmul.f32 1.442695, %v1062_v62 }
 0x37b   : > { %v1226_v0 = vpop.xlane.xlu0 %1225 }
 0x37c   : > { %1722 = vpow2.f32 %v1063_v63  ;;  %v1227_v2 = vsub.f32 %v1220_v50, %v1226_v0 }
 0x37e   : > { %v1228_v3 = vmul.f32 1.442695, %v1227_v2 }
 0x37f   : > { %v1069_v5 = vpop.permute.xlu0 %1068 }
 0x380   : > { %1724 = vpow2.f32 %v1228_v3 }
 0x382   : > { %v1721_v4 = vpop.eup %1720 }
 0x383   : > { %1585 = vmatmul.mubr.msk.f32.vlgmr.msra.gmra.mrb[6].mxu1 %vm654_vm2, %v1721_v4  ;;  %v899_v6 = vsel %vm654_vm2, %v1721_v4, 0.0 }
 0x384   : > { %1593 = vmatpush3.msra.mxu1 %v1069_v5  ;;  %900 = vadd.xlane.f32.xlu1 %v899_v6 }
 0x385   : > { %1594 = vmatprep.mubr.msk.f32.mxu1 %vm1966_vm0, %v1967_v1  ;;  %1602 = vmatprep.subr.mxu1 %v1967_v1 }
 0x386   : > { %v1723_v7 = vpop.eup %1722 }
 0x387   : > { %1595 = vmatmul.mubr.msk.f32.vlgmr.msra.gmra.mrb[8].mxu1 %vm654_vm2, %v1723_v7  ;;  %v1065_v10 = vsel %vm654_vm2, %v1723_v7, 0.0 }
 0x388   : > { %1603 = vmatpush3.msra.mxu1 %v1234_v8  ;;  %738 = vadd.xlane.f32.xlu1 %v737_v9 }
 0x389   : > { %1066 = vadd.xlane.f32.xlu0 %v1065_v10  ;;  %1604 = vmatprep.mubr.msk.f32.mxu1 %vm1966_vm0, %v1967_v1 }
 0x38a   : > { %v1725_v11 = vpop.eup %1724 }
 0x38b   : > { %1605 = vmatmul.mubr.msk.f32.vlgmr.msra.gmra.mrb[10].mxu1 %vm654_vm2, %v1725_v11  ;;  %v1230_v12 = vsel %vm654_vm2, %v1725_v11, 0.0 }
 0x38d   : > { %1231 = vadd.xlane.f32.xlu0 %v1230_v12 }
 0x3e2   : > { %v809_v13 = vpop.f32.mrb[4].mxu1 }
 0x3e3   : > { %v1576_v14 = vpop.f32.mrb[5].mxu1 }
 0x411   : > { %v901_v15 = vpop.xlane.xlu1 %900 }
 0x412   : > { %1726 = vrcp.f32 %v901_v15 }
 0x415   : > { %v739_v29 = vpop.xlane.xlu1 %738 }
 0x416   : > { %v1067_v16 = vpop.xlane.xlu0 %1066 }
 0x417   : > { %1728 = vrcp.f32 %v1067_v16 }
 0x41a   : > { %v1232_v17 = vpop.xlane.xlu0 %1231 }
 0x41b   : > { %1730 = vrcp.f32 %v1232_v17 }
 0x41c   : > { %v1727_v18 = vpop.eup %1726  ;;  %1732 = vrcp.f32 %v739_v29 }
 0x421   : > { %v1729_v1 = vpop.eup %1728 }
 0x425   : > { %v1731_v25 = vpop.eup %1730 }
 0x426   : > { %v1733_v30 = vpop.eup %1732 }
 0x427   : > { %v814_v33 = vmul.f32 %v1733_v30, %v809_v13 }
 0x456   : > { %v975_v19 = vpop.f32.mrb[6].mxu1 }
 0x457   : > { %v980_v20 = vmul.f32 %v1727_v18, %v975_v19  ;;  %v1586_v21 = vpop.f32.mrb[7].mxu1 }
 0x459   : > { %1312 = vrot.lane.b32.xlu0 %v980_v20, %s1971_s17 }
 0x45a   : > { %v1140_v22 = vpop.f32.mrb[8].mxu1 }
 0x45b   : > { %v1145_v23 = vmul.f32 %v1729_v1, %v1140_v22  ;;  %v1596_v24 = vpop.f32.mrb[9].mxu1 }
 0x45d   : > { %1316 = vrot.lane.b32.xlu1 %v1145_v23, %s1972_s12 }
 0x45e   : > { %v1305_v26 = vpop.f32.mrb[10].mxu1 }
 0x45f   : > { %v1310_v27 = vmul.f32 %v1731_v25, %v1305_v26  ;;  %v1606_v28 = vpop.f32.mrb[11].mxu1 }
 0x461   : > { %1320 = vrot.lane.b32.xlu1 %v1310_v27, %s1973_s21 }
 0x4cb   : > { %v1313_v31 = vpop.permute.xlu0 %1312 }
 0x4cc   : > { %v1323_v34 = vsel %vm654_vm2, %v814_v33, %v1313_v31 }
 0x4cf   : > { %v1317_v32 = vpop.permute.xlu1 %1316 }
 0x4d0   : > { %v1325_v35 = vsel %vm1324_vm3, %v1323_v34, %v1317_v32 }
 0x4d3   : > { %v1321_v36 = vpop.permute.xlu1 %1320 }
 0x4d4   : > { %v1327_v37 = vsel %vm1326_vm4, %v1325_v35, %v1321_v36 }
 0x4d5   : > { %1328 = vst.msk [vmem:[%s400_s13] sm:$0xff] %vm414_vm1, %v1327_v37 }
 0x4d6   : > { %1891 = shalt.err (!%p1888_p10)
}
 0x4d7   : > { %s1892_s2 = scalar_lea.hbm %s2351_s27, 128  ;;  %s1896_s20 = scalar_lea.hbm %s2404_s8, 256 }
 0x4d8   : > { %p1893_p13 = scmp.ne.s32.totalorder %s2351_s27, %s1892_s2  ;;  %p1897_p9 = scmp.lt.u32.totalorder %s2351_s27, %s2404_s8 }
 0x4d9   : > { %p1898_p3 = scmp.lt.u32.totalorder %s1896_s20, %s1892_s2  ;;  %p1900_p12 = scmp.lt.u32.totalorder %s1892_s2, %s2351_s27 }
 0x4da   : > { %p1894_p5 = pnand %p1893_p13, %p2433_p1 }
 0x4db   : > { %p1899_p7 = por %p1898_p3, %p1897_p9 }
 0x4dc   : > { %p1895_p11 = pneg %p1894_p5 }
 0x4dd   : > { %p1901_p2 = por %p1900_p12, %p1899_p7 }
 0x4df   : > { %p1902_p4 = pnand %p1901_p2, %p1895_p11 }
 0x4e1   : > { %1905 = shalt.err (!%p1902_p4)
}
 0x4e2   : > { %1641 = dma.vmem_to_hbm [thread:$0]  (%p2433_p1), %s2353_s15, 128, %s2351_s27, %s1330_s9  }
 0x4e3 PF: > { %s2434_s12 = sld [smem:[#allocation17_spill]]  ;;  %s2435_s21 = sld [smem:[#allocation18_spill]] }
 0x4e4   : > { %p2437_p8 = scmp.ge.s32.totalorder %s1956_s30, 2 }
 0x4e9   : > { %s1355_s14 = sand.u32 1, %s2434_s12   ;;  %p2436_p0 = scmp.ne.s32.totalorder %s2435_s21, 0 }
 0x4ea   : > { %s1356_s13 = scalar_lea.sflag [#allocation4], %s1355_s14 }
 0x4eb   : > { %p1661_p6 = pnand %p2437_p8, %p2436_p0 }
 0x4ed   : > { %1939 = dma.done.wait (!%p1661_p6), %s1356_s13, 128  }
 0x4ee   : > { %1941 = vsyncadd (!%p1661_p6), %s1356_s13, 4294967168  ;;  %p25_p10 = scmp.ge.s32.totalorder %s2160_s26, 4   ;;  %s2438_s27 = smov %s1948_s28 }
 0x4ef   : > { %s2439_s28 = smov %s1952_s29  ;;  %s2440_s29 = smov %s2170_s22 }
 0x4f0   : > { %s2441_s30 = smov %s2160_s26  ;;  %27 = sbr.rel (!%p25_p10) target bundleno = 12 (0xc), region = 122 }
 0x4f7   :  { %1361 = vsyncpa [#allocation3], 1 }
 0x4f8   :  { %1363 = vsyncpa [#allocation3 + $0x1], 1 }
 0x4f9   :  { %1364 = vsyncpa [#allocation6], 1 }
 0x4fa   :  { %1366 = vsyncpa [#allocation6 + $0x1], 1 }
 0x4fb   :  { %1367 = vsyncpa [#allocation9], 1 }
 0x4fc   :  { %1368 = vsyncpa [#allocation4], 1 }
 0x4fd   :  { %1370 = vsyncpa [#allocation4 + $0x1], 1 }

</bundles_post_ra>
